<compile_context>
chip_gen: v7x
topology: tpu7x:2x2x1
jax: 0.10.0
libtpu: 0.0.40
codegen_flags: <defaults>
</compile_context>

<pallas_src>
import jax
import jax.numpy as jnp
import numpy as np
from jax.experimental import pallas as pl
from jax.experimental.pallas import tpu as pltpu


def _make_gather_kernel(n_slow: int, frames_per_step: int):
    """Builds a kernel that DMA-gathers `frames_per_step` slow frames per step."""

    def kernel(idx_ref, x_ref, o_ref, sems):
        # idx_ref: SMEM (n_slow,) int32   -- scalar-prefetched temporal indices
        # x_ref:   HBM  (C, T, H*W)       -- raw ref, no auto-DMA
        # o_ref:   HBM  (C, n_slow, H*W)  -- raw ref, no auto-DMA
        # sems:    DMA semaphores, one per in-flight copy slot
        base = pl.program_id(0) * frames_per_step

        # Issue all copies for this batch; they stay in flight together so the
        # DMA engines run back-to-back at HBM bandwidth.
        for j in range(frames_per_step):
            g = base + j

            @pl.when(g < n_slow)
            def _start(g=g, j=j):
                pltpu.make_async_copy(
                    x_ref.at[:, pl.ds(idx_ref[g], 1)],   # source frame idx[g]
                    o_ref.at[:, pl.ds(g, 1)],            # dest slow slot g
                    sems.at[j],
                ).start()

        # Drain every copy issued by this grid step.
        for j in range(frames_per_step):
            g = base + j

            @pl.when(g < n_slow)
            def _wait(j=j):
                pltpu.make_async_copy(
                    x_ref.at[:, pl.ds(0, 1)],
                    o_ref.at[:, pl.ds(0, 1)],
                    sems.at[j],
                ).wait()

    return kernel


def pack_pathway(frames: jax.Array, slowfast_alpha: int = 4, *,
                 min_pallas_bytes: int = 1 << 20,
                 frames_per_step: int = 8):
    """Reproduces PackPathway.forward: returns [slow_pathway, fast_pathway]."""
    C, T, H, W = frames.shape
    n_slow = T // slowfast_alpha

    # Host-side float64 index table; matches torch.linspace(0, T-1, n).long()
    # truncation (float32 linspace can land at x.9999997 and truncate a frame
    # early for long clips).
    idx_np = np.linspace(0.0, float(T - 1), n_slow).astype(np.int32)

    fast = frames  # fast_pathway = frames (identity)

    slow_bytes = C * n_slow * H * W * frames.dtype.itemsize
    if n_slow == 0 or slow_bytes < min_pallas_bytes:
        # Tiny clips: fixed pallas_call launch + per-step overhead exceeds the
        # cost of a trivial XLA gather, so skip the kernel.
        slow = frames[:, idx_np, :, :]
        return [slow, fast]

    HW = H * W
    x = frames.reshape(C, T, HW)  # free view; lane-dense last dim

    fp = max(1, min(frames_per_step, n_slow))
    n_chunks = -(-n_slow // fp)

    kernel = _make_gather_kernel(n_slow=n_slow, frames_per_step=fp)

    slow_flat = pl.pallas_call(
        kernel,
        out_shape=jax.ShapeDtypeStruct((C, n_slow, HW), frames.dtype),
        grid_spec=pltpu.PrefetchScalarGridSpec(
            num_scalar_prefetch=1,
            grid=(n_chunks,),
            in_specs=[pl.BlockSpec(memory_space=pl.ANY)],   # raw HBM, manual DMA
            out_specs=pl.BlockSpec(memory_space=pl.ANY),    # raw HBM, manual DMA
            scratch_shapes=[pltpu.SemaphoreType.DMA((fp,))],
        ),
        compiler_params=pltpu.CompilerParams(
            dimension_semantics=("arbitrary",),
        ),
    )(jnp.asarray(idx_np, dtype=jnp.int32), x)

    slow = slow_flat.reshape(C, n_slow, H, W)
    return [slow, fast]


def _reference(frames_np: np.ndarray, alpha: int):
    C, T, H, W = frames_np.shape
    n_slow = T // alpha
    idx = np.linspace(0.0, float(T - 1), n_slow).astype(np.int64)
    return frames_np[:, idx, :, :], frames_np


if __name__ == "__main__":
    k1, k2 = jax.random.split(jax.random.PRNGKey(0))

    # Case 1: small clip (C=3, T=8, 16x16); force the Pallas path.
    C, T, H, W = 3, 8, 16, 16
    frames = jax.random.normal(k1, (C, T, H, W), dtype=jnp.float32)
    slow, fast = pack_pathway(frames, slowfast_alpha=4, min_pallas_bytes=0)
    jax.block_until_ready(slow)
    jax.block_until_ready(fast)

    ref_slow, ref_fast = _reference(np.asarray(frames), 4)
    assert slow.shape == (C, T // 4, H, W)
    assert fast.shape == (C, T, H, W)
    np.testing.assert_allclose(np.asarray(slow), ref_slow, rtol=0, atol=0)
    np.testing.assert_allclose(np.asarray(fast), ref_fast, rtol=0, atol=0)

    # Case 2: longer clip -> 10 slow frames, 8 per step (ragged last chunk).
    C2, T2, H2, W2 = 3, 40, 32, 32
    frames2 = jax.random.normal(k2, (C2, T2, H2, W2), dtype=jnp.float32)
    slow2, fast2 = pack_pathway(frames2, slowfast_alpha=4, min_pallas_bytes=0)
    jax.block_until_ready(slow2)

    ref_slow2, ref_fast2 = _reference(np.asarray(frames2), 4)
    np.testing.assert_allclose(np.asarray(slow2), ref_slow2, rtol=0, atol=0)
    np.testing.assert_allclose(np.asarray(fast2), ref_fast2, rtol=0, atol=0)

    print("KERNEL_OK")
</pallas_src>

<mosaic_0001>
module attributes {stable_mosaic.version = 11 : i64} {
  func.func @kernel(%arg0: i32, %arg1: memref<2xi32, #tpu.memory_space<smem>>, %arg2: memref<3x8x256xf32, #tpu.memory_space<any>>, %arg3: memref<3x2x256xf32, #tpu.memory_space<any>>, %arg4: memref<2x!tpu.dma_semaphore, #tpu.memory_space<semaphore_mem>>) attributes {dimension_semantics = [#tpu.dimension_semantics<arbitrary>], iteration_bounds = array<i64: 1>, scalar_prefetch = 1 : i64, scratch_operands = 1 : i64, tpu.core_type = #tpu.core_type<tc>, window_params = [{}, {}]} {
    %c2_i32 = arith.constant 2 : i32
    %0 = arith.muli %arg0, %c2_i32 : i32
    %c0_i32 = arith.constant 0 : i32
    %1 = arith.addi %0, %c0_i32 : i32
    %c2_i32_0 = arith.constant 2 : i32
    %2 = arith.cmpi slt, %1, %c2_i32_0 : i32
    %3 = arith.extui %2 : i1 to i32
    %c0_i32_1 = arith.constant 0 : i32
    %4 = arith.cmpi ne, %3, %c0_i32_1 : i32
    scf.if %4 {
      %17 = arith.index_cast %1 : i32 to index
      %18 = memref.load %arg1[%17] : memref<2xi32, #tpu.memory_space<smem>>
      %c0_i32_10 = arith.constant 0 : i32
      %c0_i32_11 = arith.constant 0 : i32
      %c0_i32_12 = arith.constant 0 : i32
      %19 = tpu.memref_slice %arg2[%c0_i32_11, %18, %c0_i32_12] : memref<3x8x256xf32, #tpu.memory_space<any>> -> memref<3x1x256xf32, #tpu.memory_space<any>>
      %c0_i32_13 = arith.constant 0 : i32
      %c0_i32_14 = arith.constant 0 : i32
      %20 = tpu.memref_slice %arg3[%c0_i32_13, %1, %c0_i32_14] : memref<3x2x256xf32, #tpu.memory_space<any>> -> memref<3x1x256xf32, #tpu.memory_space<any>>
      %21 = tpu.memref_slice %arg4[%c0_i32_10] : memref<2x!tpu.dma_semaphore, #tpu.memory_space<semaphore_mem>> -> memref<1x!tpu.dma_semaphore, #tpu.memory_space<semaphore_mem>>
      %22 = tpu.memref_squeeze %21 : memref<1x!tpu.dma_semaphore, #tpu.memory_space<semaphore_mem>> -> memref<!tpu.dma_semaphore, #tpu.memory_space<semaphore_mem>>
      tpu.enqueue_dma source(%19 : memref<3x1x256xf32, #tpu.memory_space<any>>) target(%20 : memref<3x1x256xf32, #tpu.memory_space<any>>) target_semaphore(%22 : memref<!tpu.dma_semaphore, #tpu.memory_space<semaphore_mem>>)
    } else {
    }
    %c1_i32 = arith.constant 1 : i32
    %5 = arith.addi %0, %c1_i32 : i32
    %c2_i32_2 = arith.constant 2 : i32
    %6 = arith.cmpi slt, %5, %c2_i32_2 : i32
    %7 = arith.extui %6 : i1 to i32
    %c0_i32_3 = arith.constant 0 : i32
    %8 = arith.cmpi ne, %7, %c0_i32_3 : i32
    scf.if %8 {
      %17 = arith.index_cast %5 : i32 to index
      %18 = memref.load %arg1[%17] : memref<2xi32, #tpu.memory_space<smem>>
      %c1_i32_10 = arith.constant 1 : i32
      %c0_i32_11 = arith.constant 0 : i32
      %c0_i32_12 = arith.constant 0 : i32
      %19 = tpu.memref_slice %arg2[%c0_i32_11, %18, %c0_i32_12] : memref<3x8x256xf32, #tpu.memory_space<any>> -> memref<3x1x256xf32, #tpu.memory_space<any>>
      %c0_i32_13 = arith.constant 0 : i32
      %c0_i32_14 = arith.constant 0 : i32
      %20 = tpu.memref_slice %arg3[%c0_i32_13, %5, %c0_i32_14] : memref<3x2x256xf32, #tpu.memory_space<any>> -> memref<3x1x256xf32, #tpu.memory_space<any>>
      %21 = tpu.memref_slice %arg4[%c1_i32_10] : memref<2x!tpu.dma_semaphore, #tpu.memory_space<semaphore_mem>> -> memref<1x!tpu.dma_semaphore, #tpu.memory_space<semaphore_mem>>
      %22 = tpu.memref_squeeze %21 : memref<1x!tpu.dma_semaphore, #tpu.memory_space<semaphore_mem>> -> memref<!tpu.dma_semaphore, #tpu.memory_space<semaphore_mem>>
      tpu.enqueue_dma source(%19 : memref<3x1x256xf32, #tpu.memory_space<any>>) target(%20 : memref<3x1x256xf32, #tpu.memory_space<any>>) target_semaphore(%22 : memref<!tpu.dma_semaphore, #tpu.memory_space<semaphore_mem>>)
    } else {
    }
    %c0_i32_4 = arith.constant 0 : i32
    %9 = arith.addi %0, %c0_i32_4 : i32
    %c2_i32_5 = arith.constant 2 : i32
    %10 = arith.cmpi slt, %9, %c2_i32_5 : i32
    %11 = arith.extui %10 : i1 to i32
    %c0_i32_6 = arith.constant 0 : i32
    %12 = arith.cmpi ne, %11, %c0_i32_6 : i32
    scf.if %12 {
      %c0_i32_10 = arith.constant 0 : i32
      %c0_i32_11 = arith.constant 0 : i32
      %c0_i32_12 = arith.constant 0 : i32
      %c0_i32_13 = arith.constant 0 : i32
      %17 = tpu.memref_slice %arg2[%c0_i32_11, %c0_i32_12, %c0_i32_13] : memref<3x8x256xf32, #tpu.memory_space<any>> -> memref<3x1x256xf32, #tpu.memory_space<any>>
      %c0_i32_14 = arith.constant 0 : i32
      %c0_i32_15 = arith.constant 0 : i32
      %c0_i32_16 = arith.constant 0 : i32
      %18 = tpu.memref_slice %arg3[%c0_i32_14, %c0_i32_15, %c0_i32_16] : memref<3x2x256xf32, #tpu.memory_space<any>> -> memref<3x1x256xf32, #tpu.memory_space<any>>
      %19 = tpu.memref_slice %arg4[%c0_i32_10] : memref<2x!tpu.dma_semaphore, #tpu.memory_space<semaphore_mem>> -> memref<1x!tpu.dma_semaphore, #tpu.memory_space<semaphore_mem>>
      %20 = tpu.memref_squeeze %19 : memref<1x!tpu.dma_semaphore, #tpu.memory_space<semaphore_mem>> -> memref<!tpu.dma_semaphore, #tpu.memory_space<semaphore_mem>>
      tpu.wait_dma2 semaphore(%20 : memref<!tpu.dma_semaphore, #tpu.memory_space<semaphore_mem>>) src(%17 : memref<3x1x256xf32, #tpu.memory_space<any>>) dst(%18 : memref<3x1x256xf32, #tpu.memory_space<any>>)
    } else {
    }
    %c1_i32_7 = arith.constant 1 : i32
    %13 = arith.addi %0, %c1_i32_7 : i32
    %c2_i32_8 = arith.constant 2 : i32
    %14 = arith.cmpi slt, %13, %c2_i32_8 : i32
    %15 = arith.extui %14 : i1 to i32
    %c0_i32_9 = arith.constant 0 : i32
    %16 = arith.cmpi ne, %15, %c0_i32_9 : i32
    scf.if %16 {
      %c1_i32_10 = arith.constant 1 : i32
      %c0_i32_11 = arith.constant 0 : i32
      %c0_i32_12 = arith.constant 0 : i32
      %c0_i32_13 = arith.constant 0 : i32
      %17 = tpu.memref_slice %arg2[%c0_i32_11, %c0_i32_12, %c0_i32_13] : memref<3x8x256xf32, #tpu.memory_space<any>> -> memref<3x1x256xf32, #tpu.memory_space<any>>
      %c0_i32_14 = arith.constant 0 : i32
      %c0_i32_15 = arith.constant 0 : i32
      %c0_i32_16 = arith.constant 0 : i32
      %18 = tpu.memref_slice %arg3[%c0_i32_14, %c0_i32_15, %c0_i32_16] : memref<3x2x256xf32, #tpu.memory_space<any>> -> memref<3x1x256xf32, #tpu.memory_space<any>>
      %19 = tpu.memref_slice %arg4[%c1_i32_10] : memref<2x!tpu.dma_semaphore, #tpu.memory_space<semaphore_mem>> -> memref<1x!tpu.dma_semaphore, #tpu.memory_space<semaphore_mem>>
      %20 = tpu.memref_squeeze %19 : memref<1x!tpu.dma_semaphore, #tpu.memory_space<semaphore_mem>> -> memref<!tpu.dma_semaphore, #tpu.memory_space<semaphore_mem>>
      tpu.wait_dma2 semaphore(%20 : memref<!tpu.dma_semaphore, #tpu.memory_space<semaphore_mem>>) src(%17 : memref<3x1x256xf32, #tpu.memory_space<any>>) dst(%18 : memref<3x1x256xf32, #tpu.memory_space<any>>)
    } else {
    }
    return
  }
}

</mosaic_0001>

<bundles_post_ra>
// kernel: tpu_custom_call.1
= control target key start
LH: loop header
LB: loop body
LE: loop exit
PB: predicated region body
PF: predicated region fallthrough
CT: control target
= control target key end

     0   :  { %s218_s0 = inlined_call_operand.hbm [shape: s32[2], index: 0, kind: input, shape index: {}]   ;;  %s219_s1 = inlined_call_operand.hbm [shape: f32[3,8,256], index: 1, kind: input, shape index: {}]   ;;  %s220_s2 = inlined_call_operand.hbm [shape: f32[3,2,256], index: 2, kind: output, shape index: {}]  }
   0x1   :  { %s150_s11 = scalar_lea.hbm %s218_s0, 16 }
   0x2   :  { %p151_p0 = scmp.ne.s32.totalorder %s218_s0, %s150_s11  ;;  %p154_p1 = scmp.lt.u32.totalorder %s150_s11, %s218_s0 }
   0x4   :  { %p156_p2 = pnand %p154_p1, %p151_p0 }
   0x6   :  { %159 = shalt.err (!%p156_p2)  }
   0x7   :  { %s166_s16 = smov [#allocation4]  }
   0x8   :  { %8 = dma.hbm_to_smem %s218_s0, 16, %s166_s16, [#allocation3] }
   0x9   :  { %160 = dma.done.wait [#allocation3], 16 }
   0xa   :  { %161 = vsyncadd [#allocation3], 4294967280 }
   0xb   :  { %10 = sfence }
   0xc   :  { %s16_s19 = sld [smem:[#allocation4]]  ;;  %s167_s20 = smov 128  }
   0xd   :  { %41 = sst [smem:[#allocation6]] %s167_s20  ;;  %s168_s21 = smov 32  }
   0xe   :  { %43 = sst [smem:[#allocation6 + $0x1]] %s168_s21  ;;  %s169_s22 = smov 1  }
   0xf   :  { %45 = sst [smem:[#allocation6 + $0x2]] %s169_s22  ;;  %s170_s0 = smov [#allocation2]  }
  0x10   :  { %s171_s3 = smov [#allocation5]   ;;  %s172_s4 = smov 0  }
  0x12   :  { %s17_s23 = sshrl.u32 %s16_s19, 3  ;;  %s18_s24 = sand.u32 7, %s16_s19  }
  0x13   :  { %s130_s25 = sshll.u32 %s17_s23, 4 }
  0x14   :  { %s20_s26 = sadd.s32 %s130_s25, %s18_s24 }
  0x15   :  { %s131_s27 = sshll.u32 %s20_s26, 4 }
  0x16   :  { %s22_s30 = scalar_lea.hbm %s219_s1, %s131_s27 }
  0x17   :  { %47 = dma.general %s22_s30, 96, %s220_s2, %s170_s0, %s171_s3, [#allocation6], %s172_s4, 0  }
  0x18   :  { %s132_s7 = sld [smem:[#allocation4 + $0x1]]  ;;  %s173_s8 = smov 128  }
  0x19   :  { %79 = sst [smem:[#allocation8]] %s173_s8  ;;  %s174_s9 = smov 32  }
  0x1a   :  { %81 = sst [smem:[#allocation8 + $0x1]] %s174_s9  ;;  %s175_s10 = smov 1  }
  0x1b   :  { %83 = sst [smem:[#allocation8 + $0x2]] %s175_s10  ;;  %s65_s13 = scalar_lea.hbm %s220_s2, 16 }
  0x1c   :  { %s176_s22 = smov [#allocation2 + $0x1]   ;;  %s177_s23 = smov [#allocation7]  }
  0x1d   :  { %s178_s24 = smov 0  }
  0x1e   :  { %s54_s14 = sshrl.u32 %s132_s7, 3  ;;  %s55_s15 = sand.u32 7, %s132_s7  }
  0x1f   :  { %s133_s16 = sshll.u32 %s54_s14, 4 }
  0x20   :  { %s57_s17 = sadd.s32 %s133_s16, %s55_s15 }
  0x21   :  { %s134_s18 = sshll.u32 %s57_s17, 4 }
  0x22   :  { %s59_s21 = scalar_lea.hbm %s219_s1, %s134_s18 }
  0x23   :  { %85 = dma.general %s59_s21, 96, %s65_s13, %s176_s22, %s177_s23, [#allocation8], %s178_s24, 0  }
  0x24   :  { %162 = dma.done.wait [#allocation2], 96 }
  0x25   :  { %163 = vsyncadd [#allocation2], 4294967200 }
  0x26   :  { %164 = dma.done.wait [#allocation2 + $0x1], 96 }
  0x27   :  { %165 = vsyncadd [#allocation2 + $0x1], 4294967200 }
  0x28   :  { %101 = vsyncmov [#allocation2] }
  0x2b   :  { %s102_s25 = vpop.sfrf %101 }
  0x2c   :  { %p135_p3 = scmp.ne.s32.totalorder %s102_s25, 0 }
  0x2e   :  { %106 = shalt.err (%p135_p3)  }
  0x2f   :  { %108 = vsyncmov [#allocation2 + $0x1] }
  0x32   :  { %s109_s2 = vpop.sfrf %108 }
  0x33   :  { %p136_p4 = scmp.ne.s32.totalorder %s109_s2, 0 }
  0x35   :  { %113 = shalt.err (%p136_p4)  }

</bundles_post_ra>
